<compile_context>
chip_gen: v7x
topology: tpu7x:2x2x1
jax: 0.10.0
libtpu: 0.0.40
codegen_flags: <defaults>
</compile_context>

<pallas_src>
import functools
import math

import jax
import jax.numpy as jnp
from jax.experimental import pallas as pl
from jax.experimental.pallas import tpu as pltpu


def _cdiv(a: int, b: int) -> int:
    return -(-a // b)


def _separate_fc_kernel(x_ref, w_ref, o_ref, *, norm: bool):
    # x_ref: (P_BLK, n, c_in)  w_ref: (P_BLK, c_in, c_out)  o_ref: (P_BLK, n, c_out)
    x = x_ref[...]
    w = w_ref[...]
    # Batched matmul over the part dim on native-dtype operands; f32 accumulation.
    acc = jnp.einsum("pnc,pco->pno", x, w, preferred_element_type=jnp.float32)
    if norm:
        # F.normalize(fc_bin, dim=1) == w / max(||w||_2, 1e-12) per (part, out-col).
        # Scale the f32 accumulator instead of rewriting the weight tile:
        # the rescale shrinks from c_in*c_out to n*c_out elements per part and the
        # MXU reads the weights exactly as loaded (no re-quantization for bf16).
        wf = w.astype(jnp.float32)
        sumsq = jnp.sum(wf * wf, axis=1, keepdims=True)          # (P_BLK, 1, c_out)
        inv = jax.lax.rsqrt(jnp.maximum(sumsq, 1e-24))           # == 1 / max(||w||, 1e-12)
        acc = acc * inv                                          # broadcasts over n
    o_ref[...] = acc.astype(o_ref.dtype)


def _vmem_capacity_bytes() -> int:
    try:
        return int(pltpu.get_tpu_info().vmem_capacity_bytes)
    except Exception:
        return 64 << 20  # conservative: v7x per-TensorCore VMEM


def _choose_p_block(p, per_part_bytes, *, target_grid=8, min_grid=4,
                    min_block_bytes=2 << 20, budget_bytes=None):
    """Pick how many parts to process per grid step."""
    if budget_bytes is None:
        cap = _vmem_capacity_bytes()
        # One block of (x, w, out) must leave room for double-buffering + f32 temps.
        budget_bytes = max(4 << 20, min(24 << 20, cap // 6))
    by_vmem = max(1, budget_bytes // max(per_part_bytes, 1))

    # Grid-length floor: >= target_grid steps so the DMA engine runs back-to-back
    # and both v7x TensorCores (parallel axis) get several steps each.
    cand = min(by_vmem, max(1, _cdiv(p, target_grid)))

    # ...unless that collapses the per-step DMA below min_block_bytes (per-step
    # overhead ~0.35us): then grow the block, but keep the grid >= min_grid.
    if cand * per_part_bytes < min_block_bytes:
        grown = min(by_vmem,
                    max(1, min_block_bytes // max(per_part_bytes, 1)),
                    max(1, _cdiv(p, min_grid)))
        cand = max(cand, grown)
    cand = max(1, min(cand, p))

    # Prefer a nearby block size that minimizes padded-part bandwidth waste.
    best, best_pad = cand, _cdiv(p, cand) * cand - p
    for v in range(cand - 1, max(0, cand // 2 - 1), -1):
        pad = _cdiv(p, v) * v - p
        if pad < best_pad:
            best, best_pad = v, pad
    return int(best)


def separate_fcs_part_major(x_parts, fc_bin, norm: bool = False, p_block=None,
                            compute_dtype=None):
    """Part-major entry point (preferred: no [n,c_in,p] layout transposes).

    x_parts: [p, n, c_in], fc_bin: [p, c_in, c_out] -> out: [p, n, c_out].
    """
    p, n, c_in = x_parts.shape
    p_w, c_in_w, c_out = fc_bin.shape
    assert p == p_w and c_in == c_in_w

    # Single compute dtype in the kernel (matches PyTorch promotion for mixed
    # dtypes).  Passing compute_dtype=jnp.bfloat16 halves the dominant weight
    # HBM stream while keeping f32 accumulation / norm statistics.
    if compute_dtype is None:
        compute_dtype = jnp.result_type(x_parts.dtype, fc_bin.dtype)
    x_parts = x_parts.astype(compute_dtype)
    fc_bin = fc_bin.astype(compute_dtype)
    itemsize = jnp.dtype(compute_dtype).itemsize

    # n sits on the sublane axis of both the x and out blocks: pad it so stores
    # stay unmasked (matters most on v5e's single vector-store slot).
    sublane = 32 // min(itemsize, 4)
    n_pad = _cdiv(n, sublane) * sublane

    per_part = (n_pad * c_in + c_in * c_out + n_pad * c_out) * itemsize
    if p_block is None:
        p_block = _choose_p_block(p, per_part)
    p_block = int(max(1, min(p_block, p)))
    p_pad = _cdiv(p, p_block) * p_block

    # Zero padding is NaN-safe for norm=True: rsqrt(max(0, 1e-24)) is finite and
    # multiplies a zero accumulator.
    if p_pad != p or n_pad != n:
        x_parts = jnp.pad(x_parts, ((0, p_pad - p), (0, n_pad - n), (0, 0)))
    if p_pad != p:
        fc_bin = jnp.pad(fc_bin, ((0, p_pad - p), (0, 0), (0, 0)))

    # VMEM limit from the real working set: double-buffered (x, w, out) blocks +
    # f32 accumulator / norm temps + headroom, clamped to physical VMEM
    # (64 MiB on v7x, 128 MiB on v5e/v6e).
    in_blk = p_block * (n_pad * c_in + c_in * c_out) * itemsize
    out_blk = p_block * n_pad * c_out * itemsize
    f32_tmp = p_block * n_pad * c_out * 4
    if norm:
        f32_tmp += p_block * (c_in * c_out + c_out) * 4
    cap = _vmem_capacity_bytes()
    vmem_limit = int(max(16 << 20,
                         min(2 * (in_blk + out_blk) + f32_tmp + (4 << 20),
                             cap - (8 << 20), 96 << 20)))

    # Accurate cost hint: this call is short and HBM-bound on the weight stream.
    flops = 2 * p_pad * n_pad * c_in * c_out
    bytes_accessed = (x_parts.size + fc_bin.size + p_pad * n_pad * c_out) * itemsize
    cost = pl.CostEstimate(flops=flops, transcendentals=0,
                           bytes_accessed=bytes_accessed)

    out = pl.pallas_call(
        functools.partial(_separate_fc_kernel, norm=norm),
        out_shape=jax.ShapeDtypeStruct((p_pad, n_pad, c_out), compute_dtype),
        grid_spec=pltpu.PrefetchScalarGridSpec(
            num_scalar_prefetch=0,
            grid=(p_pad // p_block,),
            in_specs=[
                pl.BlockSpec((p_block, n_pad, c_in), lambda i: (i, 0, 0)),
                pl.BlockSpec((p_block, c_in, c_out), lambda i: (i, 0, 0)),
            ],
            out_specs=pl.BlockSpec((p_block, n_pad, c_out), lambda i: (i, 0, 0)),
        ),
        compiler_params=pltpu.CompilerParams(
            dimension_semantics=("parallel",),
            vmem_limit_bytes=vmem_limit,
        ),
        cost_estimate=cost,
    )(x_parts, fc_bin)

    if p_pad != p or n_pad != n:
        out = out[:p, :n]
    return out


def separate_fcs(x, fc_bin, norm: bool = False, p_block=None, compute_dtype=None):
    """PyTorch-layout entry: x [n, c_in, p], fc_bin [p, c_in, c_out] -> [n, c_out, p].

    NOTE: the two layout transposes below each cost a full HBM read+write pass
    (~2x total bytes for this HBM-bound op).  Callers that can keep a part-major
    layout end-to-end should call separate_fcs_part_major directly.
    """
    n, c_in, p = x.shape
    x_parts = jnp.transpose(x, (2, 0, 1))                                    # [p, n, c_in]
    out_parts = separate_fcs_part_major(x_parts, fc_bin, norm=norm,
                                        p_block=p_block, compute_dtype=compute_dtype)
    return jnp.transpose(out_parts, (1, 2, 0))                               # [n, c_out, p]


def init_fc_bin(key, parts_num, in_channels, out_channels, dtype=jnp.float32):
    # Deterministic xavier-uniform-style init for the (p, c_in, c_out) parameter.
    bound = math.sqrt(6.0 / (in_channels + out_channels))
    return jax.random.uniform(
        key, (parts_num, in_channels, out_channels), dtype=dtype,
        minval=-bound, maxval=bound,
    )


if __name__ == "__main__":
    key = jax.random.PRNGKey(0)
    k1, k2, k3, k4 = jax.random.split(key, 4)

    # ---- Config 1: small smoke test (auto p_block, n padded to sublane), f32 ----
    parts_num, in_channels, out_channels, n = 8, 32, 16, 4
    x = jax.random.normal(k1, (n, in_channels, parts_num), dtype=jnp.float32)
    fc_bin = init_fc_bin(k2, parts_num, in_channels, out_channels)

    out = jax.block_until_ready(separate_fcs(x, fc_bin, norm=False))
    assert out.shape == (n, out_channels, parts_num), out.shape
    ref = jnp.einsum("ncp,pco->nop", x, fc_bin)
    assert jnp.allclose(out, ref, atol=1e-4, rtol=1e-5)

    # norm=True path (accumulator-side scaling).
    out_n = jax.block_until_ready(separate_fcs(x, fc_bin, norm=True))
    wn = fc_bin / jnp.maximum(
        jnp.sqrt(jnp.sum(fc_bin * fc_bin, axis=1, keepdims=True)), 1e-12)
    ref_n = jnp.einsum("ncp,pco->nop", x, wn)
    assert out_n.shape == (n, out_channels, parts_num)
    assert jnp.allclose(out_n, ref_n, atol=1e-4, rtol=1e-4)

    # ---- Config 2: multi-step grid + part/n padding (p=31), lane-dense c_out ----
    p2, c_in2, c_out2, n2 = 31, 128, 128, 8
    x2 = jax.random.normal(k3, (n2, c_in2, p2), dtype=jnp.float32)
    w2 = init_fc_bin(k4, p2, c_in2, c_out2)
    out2 = jax.block_until_ready(separate_fcs(x2, w2, norm=False))          # auto p_block
    assert out2.shape == (n2, c_out2, p2), out2.shape
    ref2 = jnp.einsum("ncp,pco->nop", x2, w2)
    assert jnp.allclose(out2, ref2, atol=5e-3, rtol=5e-3)
    # Explicit p_block override path still works.
    out2b = jax.block_until_ready(separate_fcs(x2, w2, norm=False, p_block=16))
    assert jnp.allclose(out2b, ref2, atol=5e-3, rtol=5e-3)

    # ---- Config 3: native bf16 operands (MXU fast path), incl. norm path ----
    x_bf = x.astype(jnp.bfloat16)
    w_bf = fc_bin.astype(jnp.bfloat16)
    out_bf = jax.block_until_ready(separate_fcs(x_bf, w_bf, norm=False))
    assert out_bf.shape == (n, out_channels, parts_num)
    ref_bf = jnp.einsum("ncp,pco->nop",
                        x_bf.astype(jnp.float32), w_bf.astype(jnp.float32))
    assert jnp.allclose(out_bf.astype(jnp.float32), ref_bf, atol=5e-2, rtol=5e-2)

    out_bf_n = jax.block_until_ready(separate_fcs(x_bf, w_bf, norm=True))
    wbf32 = w_bf.astype(jnp.float32)
    wn_bf = wbf32 / jnp.maximum(
        jnp.sqrt(jnp.sum(wbf32 * wbf32, axis=1, keepdims=True)), 1e-12)
    ref_bf_n = jnp.einsum("ncp,pco->nop", x_bf.astype(jnp.float32), wn_bf)
    assert jnp.allclose(out_bf_n.astype(jnp.float32), ref_bf_n, atol=5e-2, rtol=5e-2)

    print("KERNEL_OK")
</pallas_src>

<mosaic_0001>
module attributes {stable_mosaic.version = 11 : i64} {
  func.func @_separate_fc_kernel(%arg0: i32, %arg1: memref<2x8x32xf32, #tpu.memory_space<vmem>>, %arg2: memref<2x32x16xf32, #tpu.memory_space<vmem>>, %arg3: memref<2x8x16xf32, #tpu.memory_space<vmem>>) attributes {dimension_semantics = [#tpu.dimension_semantics<parallel>], iteration_bounds = array<i64: 4>, scalar_prefetch = 0 : i64, scratch_operands = 0 : i64, tpu.core_type = #tpu.core_type<tc>, window_params = [{transform_indices = @transform_0, window_bounds = array<i64: 2, 8, 32>}, {transform_indices = @transform_1, window_bounds = array<i64: 2, 32, 16>}, {transform_indices = @transform_2, window_bounds = array<i64: 2, 8, 16>}]} {
    %c0 = arith.constant 0 : index
    %c0_0 = arith.constant 0 : index
    %c0_1 = arith.constant 0 : index
    %0 = vector.load %arg1[%c0, %c0_0, %c0_1] : memref<2x8x32xf32, #tpu.memory_space<vmem>>, vector<2x8x32xf32>
    %c0_2 = arith.constant 0 : index
    %c0_3 = arith.constant 0 : index
    %c0_4 = arith.constant 0 : index
    %1 = vector.load %arg2[%c0_2, %c0_3, %c0_4] : memref<2x32x16xf32, #tpu.memory_space<vmem>>, vector<2x32x16xf32>
    "tpu.trace_start"() <{level = 10 : i32, message = "pnc,pco->pno"}> : () -> ()
    %cst = arith.constant dense<0.000000e+00> : vector<2x8x16xf32>
    %2 = tpu.matmul %0, %1, %cst {dimension_numbers = #tpu.dot_dimension_numbers<[2], [1], [1], [2], [0, 0, 0, 1, 1, 2], [0], [0]>} : vector<2x8x32xf32>, vector<2x32x16xf32>, vector<2x8x16xf32> -> vector<2x8x16xf32>
    "tpu.trace_stop"() : () -> ()
    %c0_5 = arith.constant 0 : index
    %c0_6 = arith.constant 0 : index
    %c0_7 = arith.constant 0 : index
    %3 = vector.load %arg3[%c0_5, %c0_6, %c0_7] : memref<2x8x16xf32, #tpu.memory_space<vmem>>, vector<2x8x16xf32>
    tpu.vector_store %arg3[%c0_5, %c0_6, %c0_7], %2 {strides = array<i32>} : memref<2x8x16xf32, #tpu.memory_space<vmem>>, vector<2x8x16xf32>,
    return
  }
  func.func @transform_0(%arg0: i32) -> (i32, i32, i32) {
    %c0_i32 = arith.constant 0 : i32
    %c0_i32_0 = arith.constant 0 : i32
    %c0_i32_1 = arith.constant 0 : i32
    return %arg0, %c0_i32, %c0_i32_0 : i32, i32, i32
  }
  func.func @transform_1(%arg0: i32) -> (i32, i32, i32) {
    %c0_i32 = arith.constant 0 : i32
    %c0_i32_0 = arith.constant 0 : i32
    %c0_i32_1 = arith.constant 0 : i32
    return %arg0, %c0_i32, %c0_i32_0 : i32, i32, i32
  }
  func.func @transform_2(%arg0: i32) -> (i32, i32, i32) {
    %c0_i32 = arith.constant 0 : i32
    %c0_i32_0 = arith.constant 0 : i32
    %c0_i32_1 = arith.constant 0 : i32
    return %arg0, %c0_i32, %c0_i32_0 : i32, i32, i32
  }
}

</mosaic_0001>

<bundles_post_ra>
// kernel: tpu_custom_call.1
= control target key start
LH: loop header
LB: loop body
LE: loop exit
PB: predicated region body
PF: predicated region fallthrough
CT: control target
= control target key end

     0   :  { %7 = vsyncpa [#allocation3], 0  ;;  %s715_s0 = inlined_call_operand.vmem [shape: f32[8,8,32], index: 0, kind: input, shape index: {}]   ;;  %s716_s1 = inlined_call_operand.vmem [shape: f32[8,32,16], index: 1, kind: input, shape index: {}]   ;;  %s717_s2 = inlined_call_operand.hbm [shape: f32[8,8,16], index: 2, kind: output, shape index: {}]  }
   0x1   :  { %9 = vsyncpa [#allocation3 + $0x1], 0  ;;  %s610_s9 = smov 0   ;;  %s612_s10 = smov 0  }
   0x2   :  { %s614_s11 = smov 0   ;;  %s616_s12 = smov 0  }
   0x3 LB: > { %s631_s13 = sadd.s32 4294967295, %s587_s12   ;;  %s418_s14 = sadd.s32 4294967294, %s587_s12   ;;  %s587_s12 = sphi %s616_s12, %s723_s12   ;;  %s583_s11 = sphi %s614_s11, %s722_s11   ;;  %s579_s10 = sphi %s612_s10, %s721_s10   ;;  %s575_s9 = sphi %s610_s9, %s720_s9  }
   0x4   : > { %s635_s15 = sadd.s32 1, %s587_s12   ;;  %s74_s16 = sadd.s32 1, %s583_s11 }
   0x5   : > { %s71_s17 = ssub.s32 %s587_s12, %s635_s15  ;;  %p84_p0 = scmp.ne.s32.totalorder %s583_s11, %s579_s10 }
   0x6   : > { %p72_p1 = scmp.eq.s32.totalorder %s71_s17, 0  ;;  %p85_p2 = scmp.eq.s32.totalorder %s631_s13, 3 }
   0x7   : > { %p90_p3 = scmp.ne.s32.totalorder %s579_s10, %s575_s9  ;;  %p91_p4 = scmp.eq.s32.totalorder %s418_s14, 3 }
   0x8   : > { %s646_s18 = scalar_select %p72_p1, %s583_s11, %s74_s16  }
   0x9   : > { %p648_p5 = por %p85_p2, %p84_p0  ;;  %p652_p6 = por %p91_p4, %p90_p3 }
   0xa   : > { %p421_p7 = scmp.ge.s32.totalorder %s587_s12, 1  ;;  %p128_p8 = scmp.lt.s32.totalorder %s587_s12, 5 }
   0xc   : > { %p129_p9 = pnand %p421_p7, %p128_p8 }
   0xd   : > { %s423_s21 = sshll.u32 (!%p129_p9), %s631_s13, 1  ;;  %v589_v0 = vmov (!%p129_p9), 0.0|0.0   ;;  %vm590_vm0 = vmmov (!%p129_p9), 0   ;;  %v591_v1 = vmov (!%p129_p9), 0.0   ;;  %vm180_vm1 = vcmask (!%p129_p9), 261120   ;;  %s153_s30 = sand.u32 (!%p129_p9), 1, %s579_s10  }
   0xe   : > { %132 = sbr.rel (%p129_p9) target bundleno = 262 (0x106), region = 28  ;;  %469 = vmatprep.subr.bf16.mxu0 (!%p129_p9), %v589_v0  ;;  %475 = vmatprep.subr.bf16.mxu1 (!%p129_p9), %v589_v0  ;;  %p157_p10 = scmp.lt.s32.totalorder (!%p129_p9), %s423_s21, 7  ;;  %vm327_vm2 = vcmask (!%p129_p9), 130048  }
   0xf   : > { %455 = vmatprep.mubr.msk.f32.mxu0 (!%p129_p9), %vm590_vm0, %v591_v1  ;;  %466 = vmatprep.mubr.msk.f32.mxu1 (!%p129_p9), %vm590_vm0, %v591_v1  ;;  %s422_s3 = sshll.u32 (!%p129_p9), %s153_s30, 4  ;;  %s436_s6 = sshll.u32 (!%p129_p9), %s631_s13, 8 }
  0x10   : > { %s155_s4 = scalar_lea.vmem (!%p129_p9), [#allocation2], %s422_s3  ;;  %s672_s14 = scalar_lea.hbm (!%p129_p9), %s717_s2, %s436_s6 }
  0x11   : > { %s344_s5 = sshll.u32 (!%p129_p9), %s155_s4, 4  ;;  %s674_s16 = scalar_lea.sflag (!%p129_p9), [#allocation3], %s153_s30  ;;  %s667_s5 = int_to_ptr.vmem [resolvable:$true] %s344_s5 }
  0x12   : > { %s525_s13 = scalar_lea.vmem (!%p129_p9), %s667_s5, 256  ;;  %s592_s17 = smov (!%p129_p9), [#allocation2]  }
  0x13   : > { %p526_p11 = scmp.ne.s32.totalorder (!%p129_p9), %s667_s5, %s525_s13 }
  0x15   : > { %s725_s21 = smov (!%p157_p10, %s423_s21), 7  ;;  %p527_p12 = pnand %p526_p11, %p648_p5 }
  0x16   : > { %s435_s22 = sshll.u32 %s725_s21, 5  ;;  %s424_s26 = sshll.u32 %s725_s21, 3 }
  0x17   : > { %s167_s25 = scalar_lea.vmem %s716_s1, %s435_s22  ;;  %s160_s29 = scalar_lea.vmem %s715_s0, %s424_s26 }
  0x18   : > { %v172_v2 = vld [vmem:[%s167_s25] sm:$0xff]  ;;  %v173_v3 = vld [vmem:[%s167_s25 + $0x8] sm:$0xff]  ;;  %v174_v7 = vld [vmem:[%s167_s25 + $0x10] sm:$0xff]  ;;  %p528_p13 = pneg %p527_p12  ;;  %s529_s21 = sshll.u32 %s592_s17, 4  ;;  %s530_s21 = int_to_ptr.vmem [resolvable:$false] %s529_s21 }
  0x19   : > { %v176_v4 = vld [vmem:[%s167_s25 + $0x20] sm:$0xff]  ;;  %v470_v5 = vpack.c.bf16 %v173_v3, %v172_v2  ;;  %v177_v6 = vld [vmem:[%s167_s25 + $0x28] sm:$0xff]  ;;  %v175_v8 = vld [vmem:[%s167_s25 + $0x18] sm:$0xff]  ;;  %s531_s22 = scalar_lea.vmem %s530_s21, 512  ;;  %p532_p0 = scmp.lt.s32.totalorder %s667_s5, %s530_s21 }
  0x1a   : > { %v476_v9 = vpack.c.bf16 %v177_v6, %v176_v4  ;;  %v178_v10 = vld [vmem:[%s167_s25 + $0x30] sm:$0xff]  ;;  %v179_v11 = vld [vmem:[%s167_s25 + $0x38] sm:$0xff]  ;;  %v473_v12 = vpack.c.bf16 %v175_v8, %v174_v7  ;;  %v170_v14 = vld [vmem:[%s160_s29] sm:$0xff]  ;;  %p533_p1 = scmp.lt.s32.totalorder %s531_s22, %s525_s13 }
  0x1b   : > { %471 = vmatpush3.bf16.msra.mxu0 %v470_v5  ;;  %v479_v13 = vpack.c.bf16 %v179_v11, %v178_v10  ;;  %v171_v15 = vld [vmem:[%s160_s29 + $0x8] sm:$0xff] }
  0x1c   : > { %477 = vmatpush3.bf16.msra.mxu1 %v476_v9  ;;  %472 = vmatprep.subr.bf16.mxu0 %v589_v0  ;;  %p534_p2 = por %p533_p1, %p532_p0 }
  0x1d   : > { %478 = vmatprep.subr.bf16.mxu1 %v589_v0 }
  0x1e   : > { %p535_p3 = pnand %p534_p2, %p528_p13 }
  0x1f   : > { %474 = vmatpush3.bf16.msra.mxu0 %v473_v12 }
  0x20   : > { %480 = vmatpush3.bf16.msra.mxu1 %v479_v13 }
  0x22   : > { %456 = vmatmul.mubr.msk.f32.vlgmr.msra.gmra.mrb[0].mxu0 %vm180_vm1, %v170_v14 }
  0x23   : > { %467 = vmatmul.mubr.msk.f32.vlgmr.msra.gmra.mrb[0].mxu1 %vm180_vm1, %v171_v15 }
  0xf5   : > { %v250_v16 = vpop.f32.mrb[0].mxu0 }
  0xf6   : > { %328 = vst.msk [vmem:[%s155_s4] sm:$0xff] %vm327_vm2, %v250_v16  ;;  %v323_v17 = vpop.f32.mrb[0].mxu1  ;;  %v457_v18 = vpop.f32.mrb[1].mxu0 }
  0xf7   : > { %329 = vst.msk [vmem:[%s155_s4 + $0x8] sm:$0xff] %vm327_vm2, %v323_v17  ;;  %v468_v19 = vpop.f32.mrb[1].mxu1 }
  0xf8   : > { %538 = shalt.err (!%p535_p3)
}
  0xf9   : > { %s539_s23 = scalar_lea.hbm %s672_s14, 256  ;;  %s543_s26 = scalar_lea.hbm %s717_s2, 1024 }
  0xfa   : > { %p540_p4 = scmp.ne.s32.totalorder %s672_s14, %s539_s23  ;;  %p544_p9 = scmp.lt.u32.totalorder %s672_s14, %s717_s2 }
  0xfb   : > { %p545_p10 = scmp.lt.u32.totalorder %s543_s26, %s539_s23  ;;  %p547_p12 = scmp.lt.u32.totalorder %s539_s23, %s672_s14 }
  0xfc   : > { %p541_p7 = pnand %p540_p4, %p648_p5 }
  0xfd   : > { %p546_p11 = por %p545_p10, %p544_p9 }
  0xfe   : > { %p542_p8 = pneg %p541_p7 }
  0xff   : > { %p548_p13 = por %p547_p12, %p546_p11 }
 0x101   : > { %p549_p0 = pnand %p548_p13, %p542_p8 }
 0x103   : > { %552 = shalt.err (!%p549_p0)
}
 0x104   : > { %s593_s29 = smov 128   ;;  %s594_s30 = smov 8  }
 0x105   : > { %481 = dma.vmem_to_hbm [thread:$0]  (%p648_p5), %s667_s5, 256, %s672_s14, %s674_s16, %s593_s29, %s593_s29, %s594_s30  }
 0x106 PF: > { %p487_p1 = scmp.ge.s32.totalorder %s587_s12, 2  ;;  %s359_s3 = sand.u32 1, %s575_s9  }
 0x107   : > { %s360_s4 = scalar_lea.sflag [#allocation3], %s359_s3 }
 0x108   : > { %p484_p2 = pnand %p487_p1, %p652_p6 }
 0x10a   : > { %570 = dma.done.wait (!%p484_p2), %s360_s4, 256  }
 0x10b   : > { %572 = vsyncadd (!%p484_p2), %s360_s4, 4294967040  ;;  %p12_p3 = scmp.ge.s32.totalorder %s635_s15, 6   ;;  %s720_s9 = smov %s579_s10 }
 0x10c   : > { %s721_s10 = smov %s583_s11  ;;  %s722_s11 = smov %s646_s18 }
 0x10d   : > { %s723_s12 = smov %s635_s15  ;;  %14 = sbr.rel (!%p12_p3) target bundleno = 3 (0x3), region = 66 }
 0x114   :  { %365 = vsyncpa [#allocation3], 1 }
 0x115   :  { %367 = vsyncpa [#allocation3 + $0x1], 1 }

</bundles_post_ra>
